<compile_context>
chip_gen: v5e
topology: v5e:2x2
jax: 0.10.0
libtpu: 0.0.40
codegen_flags: <defaults>
</compile_context>

<pallas_src>
import functools
import re

import jax
import jax.numpy as jnp
from jax.experimental import pallas as pl
from jax.experimental.pallas import tpu as pltpu


# --------------------------------------------------------------------------- #
# Best-effort hardware detection (safe fallbacks everywhere).                 #
# --------------------------------------------------------------------------- #
def _tpu_generation_and_vmem():
    gen = None
    try:
        kind = jax.devices()[0].device_kind.lower()
        m = re.search(r"(\d+)", kind)
        if m:
            gen = int(m.group(1))
    except Exception:
        gen = None
    vmem = None
    try:
        vmem = int(pltpu.get_tpu_info().vmem_capacity_bytes)
    except Exception:
        vmem = None
    if vmem is None:
        vmem = {3: 16 << 20, 4: 128 << 20, 5: 128 << 20,
                6: 128 << 20, 7: 64 << 20}.get(gen, 64 << 20)
    return gen, vmem


def _round_up(x, m):
    return -(-x // m) * m


def _round_down_to(x, m):
    return max(m, (x // m) * m)


def _pick_tf(f_padded, align, cap):
    """Largest multiple of `align` <= cap that divides f_padded exactly."""
    cap = max(align, (cap // align) * align)
    t = max(align, (min(cap, f_padded) // align) * align)
    while t > align and f_padded % t:
        t -= align
    return t


def _spec(block_shape, index_map, *, single_buffer=False):
    """BlockSpec; hint single-buffering for blocks that are never re-fetched."""
    if single_buffer and hasattr(pl, "Buffered"):
        try:
            return pl.BlockSpec(block_shape, index_map,
                                pipeline_mode=pl.Buffered(1))
        except TypeError:
            pass
    return pl.BlockSpec(block_shape, index_map)


def _narrow_for_mxu(h, w_dtype):
    # Narrow the hidden activation only for dtypes with a fast native MXU path
    # on every generation (bf16/f16).  int8 (no MXU path on v7x) and fp8 (not
    # on v5e) stay promoted to f32 and keep plain float semantics.
    # TODO(synk): scale-aware quantized matmul for int8 / fp8 weights.
    if jnp.dtype(w_dtype) in (jnp.dtype(jnp.bfloat16), jnp.dtype(jnp.float16)):
        return h.astype(w_dtype)
    return h


# --------------------------------------------------------------------------- #
# Kernels.                                                                    #
# --------------------------------------------------------------------------- #
def _ffn_resident_kernel(x_ref, w1_ref, b1_ref, w2_ref, b2_ref, o_ref):
    """Weight-resident fast path: whole FFN for one row tile per grid step."""
    h = jnp.dot(x_ref[...], w1_ref[...], preferred_element_type=jnp.float32)
    h = jnp.maximum(h + b1_ref[...].astype(jnp.float32), 0.0)
    h = _narrow_for_mxu(h, w2_ref.dtype)
    y = jnp.dot(h, w2_ref[...], preferred_element_type=jnp.float32)
    o_ref[...] = (y + b2_ref[...].astype(jnp.float32)).astype(o_ref.dtype)


def _ffn_stream_kernel(*refs, separate_acc):
    """Weight-streaming path: inner reduction over F-slices of the weights."""
    if separate_acc:
        x_ref, w1_ref, b1_ref, w2_ref, b2_ref, o_ref, acc_ref = refs
    else:
        x_ref, w1_ref, b1_ref, w2_ref, b2_ref, o_ref = refs
        acc_ref = o_ref                 # f32 output: accumulate in-place

    f = pl.program_id(1)

    @pl.when(f == 0)
    def _init():
        # Seed with the second bias: removes a separate epilogue add.
        acc_ref[...] = jnp.broadcast_to(
            b2_ref[...].astype(jnp.float32), acc_ref.shape)

    h = jnp.dot(x_ref[...], w1_ref[...], preferred_element_type=jnp.float32)
    h = jnp.maximum(h + b1_ref[...].astype(jnp.float32), 0.0)
    h = _narrow_for_mxu(h, w2_ref.dtype)
    acc_ref[...] += jnp.dot(h, w2_ref[...], preferred_element_type=jnp.float32)

    if separate_acc:
        @pl.when(f == pl.num_programs(1) - 1)
        def _store():
            o_ref[...] = acc_ref[...].astype(o_ref.dtype)


# --------------------------------------------------------------------------- #
# Wrapper.                                                                    #
# --------------------------------------------------------------------------- #
def feed_forward(x, w1, b1, w2, b2, *, tm_cap=None, tf_cap=None,
                 force_stream=False):
    """Fused Transformer FFN: relu(x @ w1 + b1) @ w2 + b2.

    x : (B, S, E); w1: (E, F); b1: (F,); w2: (F, E); b2: (E,).
    (w1/w2 are the transposed PyTorch Linear weights.)
    """
    B, S, E = x.shape
    F = w1.shape[1]
    assert w1.shape == (E, F) and w2.shape == (F, E)
    assert b1.shape == (F,) and b2.shape == (E,)
    M = B * S
    out_dtype = x.dtype

    gen, vmem_cap = _tpu_generation_and_vmem()
    vmem_budget = max(vmem_cap - (16 << 20), vmem_cap // 2)
    # 256-wide F tiles fill the 2x256^2 MXUs on v6e/v7x; 128 is full on v5e.
    f_align = 256 if (gen is not None and gen >= 6) else 128

    # ---- lane-dense zero padding (exact; padded output cols sliced off) ----
    E_p = _round_up(E, 128)
    F_p = _round_up(F, f_align)
    x2d = x.reshape(M, E)
    if E_p != E:
        x2d = jnp.pad(x2d, ((0, 0), (0, E_p - E)))
        w1 = jnp.pad(w1, ((0, E_p - E), (0, 0)))
        w2 = jnp.pad(w2, ((0, 0), (0, E_p - E)))
        b2 = jnp.pad(b2, (0, E_p - E))
    if F_p != F:
        w1 = jnp.pad(w1, ((0, 0), (0, F_p - F)))
        b1 = jnp.pad(b1, (0, F_p - F))
        w2 = jnp.pad(w2, ((0, F_p - F), (0, 0)))
    b1_2d = b1.reshape(1, F_p)
    b2_2d = b2.reshape(1, E_p)

    x_it = jnp.dtype(x.dtype).itemsize
    w1_it = jnp.dtype(w1.dtype).itemsize
    w2_it = jnp.dtype(w2.dtype).itemsize
    b1_it = jnp.dtype(b1.dtype).itemsize
    b2_it = jnp.dtype(b2.dtype).itemsize
    out_it = jnp.dtype(out_dtype).itemsize

    # ---- per-generation row-tile target -------------------------------------
    if tm_cap is None:
        tm_cap = {5: 256, 6: 1024, 7: 512}.get(gen, 256)
    if tf_cap is None:
        tf_cap = 1024 if (gen is not None and gen <= 5) else 512
    TM = _round_up(min(tm_cap, _round_up(M, 8)), 8)
    if gen is not None and gen >= 7 and M > 16:
        # Keep >= 2 row tiles so the "parallel" axis shards over both TCs.
        TM = min(TM, _round_up(pl.cdiv(M, 2), 8))

    weight_bytes = (E_p * F_p * w1_it + F_p * E_p * w2_it
                    + F_p * b1_it + E_p * b2_it)

    # ---- path selection: weight-resident vs weight-streaming ----------------
    def resident_bytes(tm):
        # Conservative: budget 2 buffers for everything even though resident
        # blocks are hinted to single-buffer.
        return (2 * weight_bytes
                + 2 * tm * E_p * (x_it + out_it)     # pipelined x / out tiles
                + tm * F_p * 4                       # in-kernel f32 hidden slab
                + (1 << 20))

    TM_res = TM
    while TM_res > 64 and resident_bytes(TM_res) > vmem_budget:
        TM_res = _round_down_to(TM_res // 2, 8)
    use_resident = (not force_stream) and resident_bytes(TM_res) <= vmem_budget

    flops = 4 * M * E_p * F_p

    if use_resident:
        TM = max(8, TM_res)
        grid = (pl.cdiv(M, TM),)

        def make_in_specs(hint):
            return [
                pl.BlockSpec((TM, E_p), lambda i: (i, 0)),                # x
                _spec((E_p, F_p), lambda i: (0, 0), single_buffer=hint),  # w1
                _spec((1, F_p), lambda i: (0, 0), single_buffer=hint),    # b1
                _spec((F_p, E_p), lambda i: (0, 0), single_buffer=hint),  # w2
                _spec((1, E_p), lambda i: (0, 0), single_buffer=hint),    # b2
            ]

        out_specs = pl.BlockSpec((TM, E_p), lambda i: (i, 0))
        scratch_shapes = []
        kernel = _ffn_resident_kernel
        dim_sem = ("parallel",)
        vmem_est = resident_bytes(TM)
        bytes_accessed = M * E_p * (x_it + out_it) + weight_bytes
    else:
        TF = _pick_tf(F_p, f_align, tf_cap)
        separate_acc = jnp.dtype(out_dtype) != jnp.dtype(jnp.float32)

        def stream_bytes(tm, tf):
            b = 2 * (tm * E_p * x_it + E_p * tf * w1_it + tf * b1_it
                     + tf * E_p * w2_it + tm * E_p * out_it)
            b += E_p * b2_it                       # b2 resident
            if separate_acc:
                b += tm * E_p * 4                  # f32 accumulator scratch
            b += tm * tf * 4                       # hidden slab for one F slice
            return b + (1 << 20)

        for _ in range(64):                        # shrink until it fits VMEM
            if stream_bytes(TM, TF) <= vmem_budget:
                break
            if TM > 128:
                TM = _round_down_to(TM // 2, 8)
            elif TF > f_align:
                TF = _pick_tf(F_p, f_align, TF // 2)
            elif TM > 8:
                TM = _round_down_to(TM // 2, 8)
            else:
                break
        TM = max(8, TM)
        grid = (pl.cdiv(M, TM), F_p // TF)

        def make_in_specs(hint):
            return [
                pl.BlockSpec((TM, E_p), lambda i, f: (i, 0)),             # x
                pl.BlockSpec((E_p, TF), lambda i, f: (0, f)),             # w1
                pl.BlockSpec((1, TF), lambda i, f: (0, f)),               # b1
                pl.BlockSpec((TF, E_p), lambda i, f: (f, 0)),             # w2
                _spec((1, E_p), lambda i, f: (0, 0), single_buffer=hint), # b2
            ]

        out_specs = pl.BlockSpec((TM, E_p), lambda i, f: (i, 0))
        scratch_shapes = ([pltpu.VMEM((TM, E_p), jnp.float32)]
                          if separate_acc else [])
        kernel = functools.partial(_ffn_stream_kernel,
                                   separate_acc=separate_acc)
        dim_sem = ("parallel", "arbitrary")
        vmem_est = stream_bytes(TM, TF)
        # Weights are re-streamed once per row tile in this path.
        bytes_accessed = (M * E_p * (x_it + out_it)
                          + pl.cdiv(M, TM) * (E_p * F_p * w1_it
                                              + F_p * E_p * w2_it
                                              + F_p * b1_it)
                          + E_p * b2_it)

    vmem_limit = int(min(vmem_budget, max(vmem_est + (4 << 20), 16 << 20)))
    cost = pl.CostEstimate(flops=int(flops), transcendentals=0,
                           bytes_accessed=int(bytes_accessed))

    def run(single_buffer_hint):
        out = pl.pallas_call(
            kernel,
            out_shape=jax.ShapeDtypeStruct((M, E_p), out_dtype),
            grid_spec=pltpu.PrefetchScalarGridSpec(
                num_scalar_prefetch=0,
                grid=grid,
                in_specs=make_in_specs(single_buffer_hint),
                out_specs=out_specs,
                scratch_shapes=scratch_shapes,
            ),
            compiler_params=pltpu.CompilerParams(
                dimension_semantics=dim_sem,
                vmem_limit_bytes=vmem_limit,
            ),
            cost_estimate=cost,
        )(x2d, w1, b1_2d, w2, b2_2d)
        return jax.block_until_ready(out)

    try:
        out2d = run(True)
    except Exception:
        # pl.Buffered(1) pipeline hint not supported on this jax/TPU combo;
        # fall back to default double-buffered BlockSpecs.
        out2d = run(False)

    if E_p != E:
        out2d = out2d[:, :E]
    return out2d.reshape(B, S, E)


# --------------------------------------------------------------------------- #
# Demo / self-test.                                                           #
# --------------------------------------------------------------------------- #
if __name__ == "__main__":
    # Hyper-params implied by the module demo: embed_size=32, ff_dim=64.
    batch, seq, embed_size, ff_dim = 2, 8, 32, 64

    key = jax.random.PRNGKey(0)
    keys = jax.random.split(key, 4)

    def make_params(k, e, f):
        kw1, kb1, kw2, kb2 = jax.random.split(k, 4)
        lim1 = 1.0 / e ** 0.5
        lim2 = 1.0 / f ** 0.5
        w1 = jax.random.uniform(kw1, (e, f), jnp.float32, -lim1, lim1)
        b1 = jax.random.uniform(kb1, (f,), jnp.float32, -lim1, lim1)
        w2 = jax.random.uniform(kw2, (f, e), jnp.float32, -lim2, lim2)
        b2 = jax.random.uniform(kb2, (e,), jnp.float32, -lim2, lim2)
        return w1, b1, w2, b2

    def reference(x, w1, b1, w2, b2):
        return jnp.maximum(x @ w1 + b1, 0.0) @ w2 + b2

    x = jax.random.normal(keys[0], (batch, seq, embed_size), dtype=jnp.float32)
    w1, b1, w2, b2 = make_params(keys[1], embed_size, ff_dim)
    ref = reference(x, w1, b1, w2, b2)

    # 1) Default config: weight-resident fast path (single row-tile grid axis).
    y = feed_forward(x, w1, b1, w2, b2)
    jax.block_until_ready(y)
    assert y.shape == (batch, seq, embed_size)
    assert jnp.allclose(y, ref, atol=1e-4, rtol=1e-4), "resident path mismatch"

    # 2) Forced weight-streaming path with multiple row tiles.
    y_s = feed_forward(x, w1, b1, w2, b2, force_stream=True, tm_cap=8)
    jax.block_until_ready(y_s)
    assert jnp.allclose(y_s, ref, atol=1e-4, rtol=1e-4), "stream path mismatch"

    # 3) Larger lane-dense shapes: exercises the multi-step F reduction with
    #    the accumulator living directly in the output block.
    b3, s3, e3, f3 = 2, 16, 128, 512
    x3 = jax.random.normal(keys[2], (b3, s3, e3), dtype=jnp.float32)
    w1_3, b1_3, w2_3, b2_3 = make_params(keys[3], e3, f3)
    ref3 = reference(x3, w1_3, b1_3, w2_3, b2_3)
    y3 = feed_forward(x3, w1_3, b1_3, w2_3, b2_3,
                      force_stream=True, tm_cap=16, tf_cap=256)
    jax.block_until_ready(y3)
    assert jnp.allclose(y3, ref3, atol=1e-3, rtol=1e-3), "F-reduction mismatch"

    print("KERNEL_OK")
</pallas_src>

<mosaic_0001>
module attributes {stable_mosaic.version = 11 : i64} {
  func.func @_ffn_resident_kernel(%arg0: i32, %arg1: memref<16x128xf32, #tpu.memory_space<vmem>>, %arg2: memref<128x128xf32, #tpu.memory_space<vmem>>, %arg3: memref<1x128xf32, #tpu.memory_space<vmem>>, %arg4: memref<128x128xf32, #tpu.memory_space<vmem>>, %arg5: memref<1x128xf32, #tpu.memory_space<vmem>>, %arg6: memref<16x128xf32, #tpu.memory_space<vmem>>) attributes {dimension_semantics = [#tpu.dimension_semantics<parallel>], iteration_bounds = array<i64: 1>, scalar_prefetch = 0 : i64, scratch_operands = 0 : i64, tpu.core_type = #tpu.core_type<tc>, window_params = [{transform_indices = @transform_0, window_bounds = array<i64: 16, 128>}, {pipeline_mode = #tpu.pipeline_mode<synchronous>, transform_indices = @transform_1, window_bounds = array<i64: 128, 128>}, {pipeline_mode = #tpu.pipeline_mode<synchronous>, transform_indices = @transform_2, window_bounds = array<i64: 1, 128>}, {pipeline_mode = #tpu.pipeline_mode<synchronous>, transform_indices = @transform_3, window_bounds = array<i64: 128, 128>}, {pipeline_mode = #tpu.pipeline_mode<synchronous>, transform_indices = @transform_4, window_bounds = array<i64: 1, 128>}, {transform_indices = @transform_5, window_bounds = array<i64: 16, 128>}]} {
    %c0 = arith.constant 0 : index
    %c0_0 = arith.constant 0 : index
    %0 = vector.load %arg1[%c0, %c0_0] : memref<16x128xf32, #tpu.memory_space<vmem>>, vector<16x128xf32>
    %c0_1 = arith.constant 0 : index
    %c0_2 = arith.constant 0 : index
    %1 = vector.load %arg2[%c0_1, %c0_2] : memref<128x128xf32, #tpu.memory_space<vmem>>, vector<128x128xf32>
    %cst = arith.constant dense<0.000000e+00> : vector<16x128xf32>
    %2 = tpu.matmul %0, %1, %cst {dimension_numbers = #tpu.dot_dimension_numbers<[1], [0], [0], [1], [0, 0, 1, 1], [], []>} : vector<16x128xf32>, vector<128x128xf32>, vector<16x128xf32> -> vector<16x128xf32>
    %c0_3 = arith.constant 0 : index
    %c0_4 = arith.constant 0 : index
    %3 = vector.load %arg3[%c0_3, %c0_4] : memref<1x128xf32, #tpu.memory_space<vmem>>, vector<1x128xf32>
    %4 = vector.broadcast %3 : vector<1x128xf32> to vector<16x128xf32>
    %5 = arith.addf %2, %4 : vector<16x128xf32>
    %cst_5 = arith.constant 0.000000e+00 : f32
    %6 = vector.broadcast %cst_5 : f32 to vector<16x128xf32>
    %7 = arith.maximumf %5, %6 : vector<16x128xf32>
    %c0_6 = arith.constant 0 : index
    %c0_7 = arith.constant 0 : index
    %8 = vector.load %arg4[%c0_6, %c0_7] : memref<128x128xf32, #tpu.memory_space<vmem>>, vector<128x128xf32>
    %cst_8 = arith.constant dense<0.000000e+00> : vector<16x128xf32>
    %9 = tpu.matmul %7, %8, %cst_8 {dimension_numbers = #tpu.dot_dimension_numbers<[1], [0], [0], [1], [0, 0, 1, 1], [], []>} : vector<16x128xf32>, vector<128x128xf32>, vector<16x128xf32> -> vector<16x128xf32>
    %c0_9 = arith.constant 0 : index
    %c0_10 = arith.constant 0 : index
    %10 = vector.load %arg5[%c0_9, %c0_10] : memref<1x128xf32, #tpu.memory_space<vmem>>, vector<1x128xf32>
    %11 = vector.broadcast %10 : vector<1x128xf32> to vector<16x128xf32>
    %12 = arith.addf %9, %11 : vector<16x128xf32>
    %c0_11 = arith.constant 0 : index
    %c0_12 = arith.constant 0 : index
    %13 = vector.load %arg6[%c0_11, %c0_12] : memref<16x128xf32, #tpu.memory_space<vmem>>, vector<16x128xf32>
    tpu.vector_store %arg6[%c0_11, %c0_12], %12 {strides = array<i32>} : memref<16x128xf32, #tpu.memory_space<vmem>>, vector<16x128xf32>,
    return
  }
  func.func @transform_0(%arg0: i32) -> (i32, i32) {
    %c0_i32 = arith.constant 0 : i32
    %c0_i32_0 = arith.constant 0 : i32
    return %arg0, %c0_i32 : i32, i32
  }
  func.func @transform_1(%arg0: i32) -> (i32, i32) {
    %c0_i32 = arith.constant 0 : i32
    %c0_i32_0 = arith.constant 0 : i32
    %c0_i32_1 = arith.constant 0 : i32
    return %c0_i32, %c0_i32_0 : i32, i32
  }
  func.func @transform_2(%arg0: i32) -> (i32, i32) {
    %c0_i32 = arith.constant 0 : i32
    %c0_i32_0 = arith.constant 0 : i32
    %c0_i32_1 = arith.constant 0 : i32
    return %c0_i32, %c0_i32_0 : i32, i32
  }
  func.func @transform_3(%arg0: i32) -> (i32, i32) {
    %c0_i32 = arith.constant 0 : i32
    %c0_i32_0 = arith.constant 0 : i32
    %c0_i32_1 = arith.constant 0 : i32
    return %c0_i32, %c0_i32_0 : i32, i32
  }
  func.func @transform_4(%arg0: i32) -> (i32, i32) {
    %c0_i32 = arith.constant 0 : i32
    %c0_i32_0 = arith.constant 0 : i32
    %c0_i32_1 = arith.constant 0 : i32
    return %c0_i32, %c0_i32_0 : i32, i32
  }
  func.func @transform_5(%arg0: i32) -> (i32, i32) {
    %c0_i32 = arith.constant 0 : i32
    %c0_i32_0 = arith.constant 0 : i32
    return %arg0, %c0_i32 : i32, i32
  }
}

module attributes {stable_mosaic.version = 11 : i64} {
  func.func @_ffn_resident_kernel(%arg0: i32, %arg1: memref<16x128xf32, #tpu.memory_space<vmem>>, %arg2: memref<128x128xf32, #tpu.memory_space<vmem>>, %arg3: memref<1x128xf32, #tpu.memory_space<vmem>>, %arg4: memref<128x128xf32, #tpu.memory_space<vmem>>, %arg5: memref<1x128xf32, #tpu.memory_space<vmem>>, %arg6: memref<16x128xf32, #tpu.memory_space<vmem>>) attributes {dimension_semantics = [#tpu.dimension_semantics<parallel>], iteration_bounds = array<i64: 1>, scalar_prefetch = 0 : i64, scratch_operands = 0 : i64, tpu.core_type = #tpu.core_type<tc>, window_params = [{transform_indices = @transform_0, window_bounds = array<i64: 16, 128>}, {pipeline_mode = #tpu.pipeline_mode<synchronous>, transform_indices = @transform_1, window_bounds = array<i64: 128, 128>}, {pipeline_mode = #tpu.pipeline_mode<synchronous>, transform_indices = @transform_2, window_bounds = array<i64: 1, 128>}, {pipeline_mode = #tpu.pipeline_mode<synchronous>, transform_indices = @transform_3, window_bounds = array<i64: 128, 128>}, {pipeline_mode = #tpu.pipeline_mode<synchronous>, transform_indices = @transform_4, window_bounds = array<i64: 1, 128>}, {transform_indices = @transform_5, window_bounds = array<i64: 16, 128>}]} {
    %c0 = arith.constant 0 : index
    %c0_0 = arith.constant 0 : index
    %0 = vector.load %arg1[%c0, %c0_0] : memref<16x128xf32, #tpu.memory_space<vmem>>, vector<16x128xf32>
    %c0_1 = arith.constant 0 : index
    %c0_2 = arith.constant 0 : index
    %1 = vector.load %arg2[%c0_1, %c0_2] : memref<128x128xf32, #tpu.memory_space<vmem>>, vector<128x128xf32>
    %cst = arith.constant dense<0.000000e+00> : vector<16x128xf32>
    %2 = tpu.matmul %0, %1, %cst {dimension_numbers = #tpu.dot_dimension_numbers<[1], [0], [0], [1], [0, 0, 1, 1], [], []>} : vector<16x128xf32>, vector<128x128xf32>, vector<16x128xf32> -> vector<16x128xf32>
    %c0_3 = arith.constant 0 : index
    %c0_4 = arith.constant 0 : index
    %3 = vector.load %arg3[%c0_3, %c0_4] : memref<1x128xf32, #tpu.memory_space<vmem>>, vector<1x128xf32>
    %4 = vector.broadcast %3 : vector<1x128xf32> to vector<16x128xf32>
    %5 = arith.addf %2, %4 : vector<16x128xf32>
    %cst_5 = arith.constant 0.000000e+00 : f32
    %6 = vector.broadcast %cst_5 : f32 to vector<16x128xf32>
    %7 = arith.maximumf %5, %6 : vector<16x128xf32>
    %c0_6 = arith.constant 0 : index
    %c0_7 = arith.constant 0 : index
    %8 = vector.load %arg4[%c0_6, %c0_7] : memref<128x128xf32, #tpu.memory_space<vmem>>, vector<128x128xf32>
    %cst_8 = arith.constant dense<0.000000e+00> : vector<16x128xf32>
    %9 = tpu.matmul %7, %8, %cst_8 {dimension_numbers = #tpu.dot_dimension_numbers<[1], [0], [0], [1], [0, 0, 1, 1], [], []>} : vector<16x128xf32>, vector<128x128xf32>, vector<16x128xf32> -> vector<16x128xf32>
    %c0_9 = arith.constant 0 : index
    %c0_10 = arith.constant 0 : index
    %10 = vector.load %arg5[%c0_9, %c0_10] : memref<1x128xf32, #tpu.memory_space<vmem>>, vector<1x128xf32>
    %11 = vector.broadcast %10 : vector<1x128xf32> to vector<16x128xf32>
    %12 = arith.addf %9, %11 : vector<16x128xf32>
    %c0_11 = arith.constant 0 : index
    %c0_12 = arith.constant 0 : index
    %13 = vector.load %arg6[%c0_11, %c0_12] : memref<16x128xf32, #tpu.memory_space<vmem>>, vector<16x128xf32>
    tpu.vector_store %arg6[%c0_11, %c0_12], %12 {strides = array<i32>} : memref<16x128xf32, #tpu.memory_space<vmem>>, vector<16x128xf32>,
    return
  }
  func.func @transform_0(%arg0: i32) -> (i32, i32) {
    %c0_i32 = arith.constant 0 : i32
    %c0_i32_0 = arith.constant 0 : i32
    return %arg0, %c0_i32 : i32, i32
  }
  func.func @transform_1(%arg0: i32) -> (i32, i32) {
    %c0_i32 = arith.constant 0 : i32
    %c0_i32_0 = arith.constant 0 : i32
    %c0_i32_1 = arith.constant 0 : i32
    return %c0_i32, %c0_i32_0 : i32, i32
  }
  func.func @transform_2(%arg0: i32) -> (i32, i32) {
    %c0_i32 = arith.constant 0 : i32
    %c0_i32_0 = arith.constant 0 : i32
    %c0_i32_1 = arith.constant 0 : i32
    return %c0_i32, %c0_i32_0 : i32, i32
  }
  func.func @transform_3(%arg0: i32) -> (i32, i32) {
    %c0_i32 = arith.constant 0 : i32
    %c0_i32_0 = arith.constant 0 : i32
    %c0_i32_1 = arith.constant 0 : i32
    return %c0_i32, %c0_i32_0 : i32, i32
  }
  func.func @transform_4(%arg0: i32) -> (i32, i32) {
    %c0_i32 = arith.constant 0 : i32
    %c0_i32_0 = arith.constant 0 : i32
    %c0_i32_1 = arith.constant 0 : i32
    return %c0_i32, %c0_i32_0 : i32, i32
  }
  func.func @transform_5(%arg0: i32) -> (i32, i32) {
    %c0_i32 = arith.constant 0 : i32
    %c0_i32_0 = arith.constant 0 : i32
    return %arg0, %c0_i32 : i32, i32
  }
}

</mosaic_0001>

<bundles_post_ra>
// kernel: tpu_custom_call.1
= control target key start
LH: loop header
LB: loop body
LE: loop exit
PB: predicated region body
PF: predicated region fallthrough
CT: control target
= control target key end

     0   :  { %10 = vsyncpa [#allocation3], 0  ;;  %s388_s0 = inlined_call_operand.hbm [shape: f32[16,128], index: 0, kind: input, shape index: {}]   ;;  %s389_s1 = inlined_call_operand.hbm [shape: f32[128,128], index: 1, kind: input, shape index: {}]   ;;  %s390_s2 = inlined_call_operand.vmem [shape: f32[1,128], index: 2, kind: input, shape index: {}]   ;;  %s391_s3 = inlined_call_operand.hbm [shape: f32[128,128], index: 3, kind: input, shape index: {}]   ;;  %s392_s4 = inlined_call_operand.vmem [shape: f32[1,128], index: 4, kind: input, shape index: {}]   ;;  %s393_s5 = inlined_call_operand.hbm [shape: f32[16,128], index: 5, kind: output, shape index: {}]  }
   0x1   :  { %11 = vsyncpa [#allocation6], 0 }
   0x2   :  { %12 = vsyncpa [#allocation4], 0  ;;  %s30_s20 = sshll.u32 %s389_s1, 4  ;;  %s322_s21 = smov [#allocation5]   ;;  %s31_s20 = int_to_ptr.hbm [resolvable:$true] %s30_s20 }
   0x3   :  { %s32_s22 = sshll.u32 %s322_s21, 4  ;;  %s17_s25 = sshll.u32 %s388_s0, 4  ;;  %s33_s22 = int_to_ptr.vmem [resolvable:$true] %s32_s22  ;;  %s18_s25 = int_to_ptr.hbm [resolvable:$true] %s17_s25 }
   0x4   :  { %s323_s26 = smov 128   ;;  %s324_s27 = smov 8  }
   0x5   :  { %38 = dma.hbm_to_vmem [thread:$0]  %s31_s20, 2048, %s33_s22, [#allocation6], %s323_s26, %s323_s26, %s324_s27  }
   0x6   :  { %s325_s28 = smov [#allocation2]   ;;  %s45_s1 = sshll.u32 %s391_s3, 4  ;;  %s46_s1 = int_to_ptr.hbm [resolvable:$true] %s45_s1 }
   0x7   :  { %s19_s29 = sshll.u32 %s325_s28, 4  ;;  %s326_s0 = smov [#allocation7]   ;;  %s20_s29 = int_to_ptr.vmem [resolvable:$true] %s19_s29 }
   0x8   :  { %25 = dma.hbm_to_vmem [thread:$0]  %s18_s25, 256, %s20_s29, [#allocation3], %s323_s26, %s323_s26, %s324_s27  }
   0x9   :  { %s47_s7 = sshll.u32 %s326_s0, 4  ;;  %s48_s7 = int_to_ptr.vmem [resolvable:$true] %s47_s7 }
   0xa   :  { %53 = dma.hbm_to_vmem [thread:$0]  %s46_s1, 2048, %s48_s7, [#allocation6], %s323_s26, %s323_s26, %s324_s27  }
   0xb   :  { %316 = dma.done.wait [#allocation3], 256  }
   0xc   :  { %317 = vsyncadd [#allocation3], 4294967040 }
   0xd   :  { %318 = dma.done.wait [#allocation6], 4096  }
   0xe   :  { %319 = vsyncadd [#allocation6], 4294963200  ;;  %v85_v0 = vld [vmem:[#allocation5 + $0x78] sm:$0xff]  ;;  %v84_v1 = vld [vmem:[#allocation5 + $0x70] sm:$0xff]  ;;  %s327_s11 = smov [#allocation8]  }
   0xf   :  { %180 = vmatpush.msra.mxu2 %v85_v0  ;;  %90 = vmatpush.msra.mxu0 %v85_v0  ;;  %v83_v2 = vld [vmem:[#allocation5 + $0x68] sm:$0xff]  ;;  %v82_v3 = vld [vmem:[#allocation5 + $0x60] sm:$0xff]  ;;  %v81_v4 = vld [vmem:[#allocation5 + $0x58] sm:$0xff]  ;;  %s164_s12 = sshll.u32 %s327_s11, 4  ;;  %s165_s12 = int_to_ptr.vmem [resolvable:$true] %s164_s12 }
  0x10   :  { %v130_v5 = vld [vmem:[#allocation7 + $0x78] sm:$0xff]  ;;  %v129_v6 = vld [vmem:[#allocation7 + $0x70] sm:$0xff]  ;;  %v128_v8 = vld [vmem:[#allocation7 + $0x68] sm:$0xff] }
  0x11   :  { %181 = vmatpush.msra.mxu2 %v84_v1  ;;  %91 = vmatpush.msra.mxu0 %v84_v1  ;;  %v80_v7 = vld [vmem:[#allocation5 + $0x50] sm:$0xff]  ;;  %v79_v9 = vld [vmem:[#allocation5 + $0x48] sm:$0xff]  ;;  %v127_v10 = vld [vmem:[#allocation7 + $0x60] sm:$0xff] }
  0x12   :  { %196 = vmatpush.msra.mxu3 %v130_v5  ;;  %135 = vmatpush.msra.mxu1 %v130_v5  ;;  %v78_v11 = vld [vmem:[#allocation5 + $0x40] sm:$0xff]  ;;  %v126_v12 = vld [vmem:[#allocation7 + $0x58] sm:$0xff]  ;;  %v125_v14 = vld [vmem:[#allocation7 + $0x50] sm:$0xff] }
  0x13   :  { %182 = vmatpush.msra.mxu2 %v83_v2  ;;  %92 = vmatpush.msra.mxu0 %v83_v2  ;;  %v77_v13 = vld [vmem:[#allocation5 + $0x38] sm:$0xff]  ;;  %v76_v15 = vld [vmem:[#allocation5 + $0x30] sm:$0xff]  ;;  %v124_v16 = vld [vmem:[#allocation7 + $0x48] sm:$0xff] }
  0x14   :  { %197 = vmatpush.msra.mxu3 %v129_v6  ;;  %136 = vmatpush.msra.mxu1 %v129_v6  ;;  %v75_v17 = vld [vmem:[#allocation5 + $0x28] sm:$0xff]  ;;  %v123_v18 = vld [vmem:[#allocation7 + $0x40] sm:$0xff]  ;;  %v122_v20 = vld [vmem:[#allocation7 + $0x38] sm:$0xff] }
  0x15   :  { %183 = vmatpush.msra.mxu2 %v82_v3  ;;  %93 = vmatpush.msra.mxu0 %v82_v3  ;;  %v74_v19 = vld [vmem:[#allocation5 + $0x20] sm:$0xff]  ;;  %v73_v21 = vld [vmem:[#allocation5 + $0x18] sm:$0xff]  ;;  %v121_v22 = vld [vmem:[#allocation7 + $0x30] sm:$0xff] }
  0x16   :  { %198 = vmatpush.msra.mxu3 %v128_v8  ;;  %137 = vmatpush.msra.mxu1 %v128_v8  ;;  %v72_v23 = vld [vmem:[#allocation5 + $0x10] sm:$0xff]  ;;  %v120_v24 = vld [vmem:[#allocation7 + $0x28] sm:$0xff]  ;;  %v119_v26 = vld [vmem:[#allocation7 + $0x20] sm:$0xff] }
  0x17   :  { %184 = vmatpush.msra.mxu2 %v81_v4  ;;  %94 = vmatpush.msra.mxu0 %v81_v4  ;;  %v71_v25 = vld [vmem:[#allocation5 + $0x8] sm:$0xff]  ;;  %v70_v27 = vld [vmem:[#allocation5] sm:$0xff]  ;;  %v69_v28 = vld [vmem:[#allocation2 + $0x8] sm:$0xff] }
  0x18   :  { %199 = vmatpush.msra.mxu3 %v127_v10  ;;  %138 = vmatpush.msra.mxu1 %v127_v10  ;;  %v68_v29 = vld [vmem:[#allocation2] sm:$0xff]  ;;  %v118_v30 = vld [vmem:[#allocation7 + $0x18] sm:$0xff]  ;;  %v116_v32 = vld [vmem:[#allocation7 + $0x8] sm:$0xff] }
  0x19   :  { %185 = vmatpush.msra.mxu2 %v80_v7  ;;  %95 = vmatpush.msra.mxu0 %v80_v7  ;;  %v117_v31 = vld [vmem:[#allocation7 + $0x10] sm:$0xff]  ;;  %v115_v33 = vld [vmem:[#allocation7] sm:$0xff] }
  0x1a   :  { %200 = vmatpush.msra.mxu3 %v126_v12  ;;  %139 = vmatpush.msra.mxu1 %v126_v12  ;;  %v218_v34 = vld [vmem:[%s390_s2] ss:$0 sm:$0xff]  ;;  %s166_s2 = sshll.u32 %s393_s5, 4  ;;  %s167_s2 = int_to_ptr.hbm [resolvable:$true] %s166_s2 }
  0x1b   :  { %186 = vmatpush.msra.mxu2 %v79_v9  ;;  %96 = vmatpush.msra.mxu0 %v79_v9  ;;  %v219_v41 = vld [vmem:[%s392_s4] ss:$0 sm:$0xff] }
  0x1c   :  { %201 = vmatpush.msra.mxu3 %v125_v14  ;;  %140 = vmatpush.msra.mxu1 %v125_v14 }
  0x1d   :  { %187 = vmatpush.msra.mxu2 %v78_v11  ;;  %97 = vmatpush.msra.mxu0 %v78_v11 }
  0x1e   :  { %202 = vmatpush.msra.mxu3 %v124_v16  ;;  %141 = vmatpush.msra.mxu1 %v124_v16 }
  0x1f   :  { %188 = vmatpush.msra.mxu2 %v77_v13  ;;  %98 = vmatpush.msra.mxu0 %v77_v13 }
  0x20   :  { %203 = vmatpush.msra.mxu3 %v123_v18  ;;  %142 = vmatpush.msra.mxu1 %v123_v18 }
  0x21   :  { %189 = vmatpush.msra.mxu2 %v76_v15  ;;  %99 = vmatpush.msra.mxu0 %v76_v15 }
  0x22   :  { %204 = vmatpush.msra.mxu3 %v122_v20  ;;  %143 = vmatpush.msra.mxu1 %v122_v20 }
  0x23   :  { %190 = vmatpush.msra.mxu2 %v75_v17  ;;  %100 = vmatpush.msra.mxu0 %v75_v17 }
  0x24   :  { %205 = vmatpush.msra.mxu3 %v121_v22  ;;  %144 = vmatpush.msra.mxu1 %v121_v22 }
  0x25   :  { %191 = vmatpush.msra.mxu2 %v74_v19  ;;  %101 = vmatpush.msra.mxu0 %v74_v19 }
  0x26   :  { %206 = vmatpush.msra.mxu3 %v120_v24  ;;  %145 = vmatpush.msra.mxu1 %v120_v24 }
  0x27   :  { %192 = vmatpush.msra.mxu2 %v73_v21  ;;  %102 = vmatpush.msra.mxu0 %v73_v21 }
  0x28   :  { %207 = vmatpush.msra.mxu3 %v119_v26  ;;  %146 = vmatpush.msra.mxu1 %v119_v26 }
  0x29   :  { %193 = vmatpush.msra.mxu2 %v72_v23  ;;  %103 = vmatpush.msra.mxu0 %v72_v23 }
  0x2a   :  { %208 = vmatpush.msra.mxu3 %v118_v30  ;;  %147 = vmatpush.msra.mxu1 %v118_v30 }
  0x2b   :  { %194 = vmatpush.msra.mxu2 %v71_v25  ;;  %104 = vmatpush.msra.mxu0 %v71_v25 }
  0x2c   :  { %209 = vmatpush.msra.mxu3 %v117_v31  ;;  %148 = vmatpush.msra.mxu1 %v117_v31 }
  0x2d   :  { %195 = vmatpush.msra.mxu2 %v70_v27  ;;  %105 = vmatpush.msra.mxu0 %v70_v27 }
  0x2e   :  { %109 = vmatmul.f32.vlgmr.msra.gmra.mxu2 %v69_v28  ;;  %106 = vmatmul.f32.vlgmr.msra.gmra.mxu0 %v68_v29 }
  0x2f   :  { %210 = vmatpush.msra.mxu3 %v116_v32  ;;  %149 = vmatpush.msra.mxu1 %v116_v32 }
  0x31   :  { %211 = vmatpush.msra.mxu3 %v115_v33  ;;  %150 = vmatpush.msra.mxu1 %v115_v33 }
  0xab   :  { %v107_v35 = vpop.f32.mrf.mxu0 }
  0xac   :  { %v108_v36 = vadd.f32 %v218_v34, %v107_v35 }
  0xae   :  { %v113_v37 = vmax.f32 %v108_v36, 0.0 }
  0xb0   :  { %151 = vmatmul.f32.vlgmr.msra.gmra.mxu1 %v113_v37 }
  0xb1   :  { %v110_v38 = vpop.f32.mrf.mxu2 }
  0xb2   :  { %v111_v39 = vadd.f32 %v218_v34, %v110_v38 }
  0xb4   :  { %v114_v40 = vmax.f32 %v111_v39, 0.0 }
  0xb6   :  { %154 = vmatmul.f32.vlgmr.msra.gmra.mxu3 %v114_v40 }
 0x12d   :  { %v152_v42 = vpop.f32.mrf.mxu1 }
 0x12e   :  { %v153_v43 = vadd.f32 %v219_v41, %v152_v42 }
 0x130   :  { %158 = vst [vmem:[#allocation8] sm:$0xff] %v153_v43 }
 0x139   :  { %v155_v44 = vpop.f32.mrf.mxu3 }
 0x13a   :  { %v156_v45 = vadd.f32 %v219_v41, %v155_v44 }
 0x13c   :  { %159 = vst [vmem:[#allocation8 + $0x8] sm:$0xff] %v156_v45 }
 0x13d   :  { %172 = dma.vmem_to_hbm [thread:$0]  %s165_s12, 256, %s167_s2, [#allocation4], %s323_s26, %s323_s26, %s324_s27  }
 0x13e   :  { %320 = dma.done.wait [#allocation4], 256  }
 0x13f   :  { %321 = vsyncadd [#allocation4], 4294967040 }
 0x140   :  { %177 = vsyncpa [#allocation3], 1 }
 0x141   :  { %178 = vsyncpa [#allocation6], 1 }
 0x142   :  { %179 = vsyncpa [#allocation4], 1 }

// kernel: tpu_custom_call.1
= control target key start
LH: loop header
LB: loop body
LE: loop exit
PB: predicated region body
PF: predicated region fallthrough
CT: control target
= control target key end

     0   :  { %10 = vsyncpa [#allocation3], 0  ;;  %s388_s0 = inlined_call_operand.hbm [shape: f32[16,128], index: 0, kind: input, shape index: {}]   ;;  %s389_s1 = inlined_call_operand.hbm [shape: f32[128,128], index: 1, kind: input, shape index: {}]   ;;  %s390_s2 = inlined_call_operand.vmem [shape: f32[1,128], index: 2, kind: input, shape index: {}]   ;;  %s391_s3 = inlined_call_operand.hbm [shape: f32[128,128], index: 3, kind: input, shape index: {}]   ;;  %s392_s4 = inlined_call_operand.vmem [shape: f32[1,128], index: 4, kind: input, shape index: {}]   ;;  %s393_s5 = inlined_call_operand.hbm [shape: f32[16,128], index: 5, kind: output, shape index: {}]  }
   0x1   :  { %11 = vsyncpa [#allocation6], 0 }
   0x2   :  { %12 = vsyncpa [#allocation4], 0  ;;  %s30_s20 = sshll.u32 %s389_s1, 4  ;;  %s322_s21 = smov [#allocation5]   ;;  %s31_s20 = int_to_ptr.hbm [resolvable:$true] %s30_s20 }
   0x3   :  { %s32_s22 = sshll.u32 %s322_s21, 4  ;;  %s17_s25 = sshll.u32 %s388_s0, 4  ;;  %s33_s22 = int_to_ptr.vmem [resolvable:$true] %s32_s22  ;;  %s18_s25 = int_to_ptr.hbm [resolvable:$true] %s17_s25 }
   0x4   :  { %s323_s26 = smov 128   ;;  %s324_s27 = smov 8  }
   0x5   :  { %38 = dma.hbm_to_vmem [thread:$0]  %s31_s20, 2048, %s33_s22, [#allocation6], %s323_s26, %s323_s26, %s324_s27  }
   0x6   :  { %s325_s28 = smov [#allocation2]   ;;  %s45_s1 = sshll.u32 %s391_s3, 4  ;;  %s46_s1 = int_to_ptr.hbm [resolvable:$true] %s45_s1 }
   0x7   :  { %s19_s29 = sshll.u32 %s325_s28, 4  ;;  %s326_s0 = smov [#allocation7]   ;;  %s20_s29 = int_to_ptr.vmem [resolvable:$true] %s19_s29 }
   0x8   :  { %25 = dma.hbm_to_vmem [thread:$0]  %s18_s25, 256, %s20_s29, [#allocation3], %s323_s26, %s323_s26, %s324_s27  }
   0x9   :  { %s47_s7 = sshll.u32 %s326_s0, 4  ;;  %s48_s7 = int_to_ptr.vmem [resolvable:$true] %s47_s7 }
   0xa   :  { %53 = dma.hbm_to_vmem [thread:$0]  %s46_s1, 2048, %s48_s7, [#allocation6], %s323_s26, %s323_s26, %s324_s27  }
   0xb   :  { %316 = dma.done.wait [#allocation3], 256  }
   0xc   :  { %317 = vsyncadd [#allocation3], 4294967040 }
   0xd   :  { %318 = dma.done.wait [#allocation6], 4096  }
   0xe   :  { %319 = vsyncadd [#allocation6], 4294963200  ;;  %v85_v0 = vld [vmem:[#allocation5 + $0x78] sm:$0xff]  ;;  %v84_v1 = vld [vmem:[#allocation5 + $0x70] sm:$0xff]  ;;  %s327_s11 = smov [#allocation8]  }
   0xf   :  { %180 = vmatpush.msra.mxu2 %v85_v0  ;;  %90 = vmatpush.msra.mxu0 %v85_v0  ;;  %v83_v2 = vld [vmem:[#allocation5 + $0x68] sm:$0xff]  ;;  %v82_v3 = vld [vmem:[#allocation5 + $0x60] sm:$0xff]  ;;  %v81_v4 = vld [vmem:[#allocation5 + $0x58] sm:$0xff]  ;;  %s164_s12 = sshll.u32 %s327_s11, 4  ;;  %s165_s12 = int_to_ptr.vmem [resolvable:$true] %s164_s12 }
  0x10   :  { %v130_v5 = vld [vmem:[#allocation7 + $0x78] sm:$0xff]  ;;  %v129_v6 = vld [vmem:[#allocation7 + $0x70] sm:$0xff]  ;;  %v128_v8 = vld [vmem:[#allocation7 + $0x68] sm:$0xff] }
  0x11   :  { %181 = vmatpush.msra.mxu2 %v84_v1  ;;  %91 = vmatpush.msra.mxu0 %v84_v1  ;;  %v80_v7 = vld [vmem:[#allocation5 + $0x50] sm:$0xff]  ;;  %v79_v9 = vld [vmem:[#allocation5 + $0x48] sm:$0xff]  ;;  %v127_v10 = vld [vmem:[#allocation7 + $0x60] sm:$0xff] }
  0x12   :  { %196 = vmatpush.msra.mxu3 %v130_v5  ;;  %135 = vmatpush.msra.mxu1 %v130_v5  ;;  %v78_v11 = vld [vmem:[#allocation5 + $0x40] sm:$0xff]  ;;  %v126_v12 = vld [vmem:[#allocation7 + $0x58] sm:$0xff]  ;;  %v125_v14 = vld [vmem:[#allocation7 + $0x50] sm:$0xff] }
  0x13   :  { %182 = vmatpush.msra.mxu2 %v83_v2  ;;  %92 = vmatpush.msra.mxu0 %v83_v2  ;;  %v77_v13 = vld [vmem:[#allocation5 + $0x38] sm:$0xff]  ;;  %v76_v15 = vld [vmem:[#allocation5 + $0x30] sm:$0xff]  ;;  %v124_v16 = vld [vmem:[#allocation7 + $0x48] sm:$0xff] }
  0x14   :  { %197 = vmatpush.msra.mxu3 %v129_v6  ;;  %136 = vmatpush.msra.mxu1 %v129_v6  ;;  %v75_v17 = vld [vmem:[#allocation5 + $0x28] sm:$0xff]  ;;  %v123_v18 = vld [vmem:[#allocation7 + $0x40] sm:$0xff]  ;;  %v122_v20 = vld [vmem:[#allocation7 + $0x38] sm:$0xff] }
  0x15   :  { %183 = vmatpush.msra.mxu2 %v82_v3  ;;  %93 = vmatpush.msra.mxu0 %v82_v3  ;;  %v74_v19 = vld [vmem:[#allocation5 + $0x20] sm:$0xff]  ;;  %v73_v21 = vld [vmem:[#allocation5 + $0x18] sm:$0xff]  ;;  %v121_v22 = vld [vmem:[#allocation7 + $0x30] sm:$0xff] }
  0x16   :  { %198 = vmatpush.msra.mxu3 %v128_v8  ;;  %137 = vmatpush.msra.mxu1 %v128_v8  ;;  %v72_v23 = vld [vmem:[#allocation5 + $0x10] sm:$0xff]  ;;  %v120_v24 = vld [vmem:[#allocation7 + $0x28] sm:$0xff]  ;;  %v119_v26 = vld [vmem:[#allocation7 + $0x20] sm:$0xff] }
  0x17   :  { %184 = vmatpush.msra.mxu2 %v81_v4  ;;  %94 = vmatpush.msra.mxu0 %v81_v4  ;;  %v71_v25 = vld [vmem:[#allocation5 + $0x8] sm:$0xff]  ;;  %v70_v27 = vld [vmem:[#allocation5] sm:$0xff]  ;;  %v69_v28 = vld [vmem:[#allocation2 + $0x8] sm:$0xff] }
  0x18   :  { %199 = vmatpush.msra.mxu3 %v127_v10  ;;  %138 = vmatpush.msra.mxu1 %v127_v10  ;;  %v68_v29 = vld [vmem:[#allocation2] sm:$0xff]  ;;  %v118_v30 = vld [vmem:[#allocation7 + $0x18] sm:$0xff]  ;;  %v116_v32 = vld [vmem:[#allocation7 + $0x8] sm:$0xff] }
  0x19   :  { %185 = vmatpush.msra.mxu2 %v80_v7  ;;  %95 = vmatpush.msra.mxu0 %v80_v7  ;;  %v117_v31 = vld [vmem:[#allocation7 + $0x10] sm:$0xff]  ;;  %v115_v33 = vld [vmem:[#allocation7] sm:$0xff] }
  0x1a   :  { %200 = vmatpush.msra.mxu3 %v126_v12  ;;  %139 = vmatpush.msra.mxu1 %v126_v12  ;;  %v218_v34 = vld [vmem:[%s390_s2] ss:$0 sm:$0xff]  ;;  %s166_s2 = sshll.u32 %s393_s5, 4  ;;  %s167_s2 = int_to_ptr.hbm [resolvable:$true] %s166_s2 }
  0x1b   :  { %186 = vmatpush.msra.mxu2 %v79_v9  ;;  %96 = vmatpush.msra.mxu0 %v79_v9  ;;  %v219_v41 = vld [vmem:[%s392_s4] ss:$0 sm:$0xff] }
  0x1c   :  { %201 = vmatpush.msra.mxu3 %v125_v14  ;;  %140 = vmatpush.msra.mxu1 %v125_v14 }
  0x1d   :  { %187 = vmatpush.msra.mxu2 %v78_v11  ;;  %97 = vmatpush.msra.mxu0 %v78_v11 }
  0x1e   :  { %202 = vmatpush.msra.mxu3 %v124_v16  ;;  %141 = vmatpush.msra.mxu1 %v124_v16 }
  0x1f   :  { %188 = vmatpush.msra.mxu2 %v77_v13  ;;  %98 = vmatpush.msra.mxu0 %v77_v13 }
  0x20   :  { %203 = vmatpush.msra.mxu3 %v123_v18  ;;  %142 = vmatpush.msra.mxu1 %v123_v18 }
  0x21   :  { %189 = vmatpush.msra.mxu2 %v76_v15  ;;  %99 = vmatpush.msra.mxu0 %v76_v15 }
  0x22   :  { %204 = vmatpush.msra.mxu3 %v122_v20  ;;  %143 = vmatpush.msra.mxu1 %v122_v20 }
  0x23   :  { %190 = vmatpush.msra.mxu2 %v75_v17  ;;  %100 = vmatpush.msra.mxu0 %v75_v17 }
  0x24   :  { %205 = vmatpush.msra.mxu3 %v121_v22  ;;  %144 = vmatpush.msra.mxu1 %v121_v22 }
  0x25   :  { %191 = vmatpush.msra.mxu2 %v74_v19  ;;  %101 = vmatpush.msra.mxu0 %v74_v19 }
  0x26   :  { %206 = vmatpush.msra.mxu3 %v120_v24  ;;  %145 = vmatpush.msra.mxu1 %v120_v24 }
  0x27   :  { %192 = vmatpush.msra.mxu2 %v73_v21  ;;  %102 = vmatpush.msra.mxu0 %v73_v21 }
  0x28   :  { %207 = vmatpush.msra.mxu3 %v119_v26  ;;  %146 = vmatpush.msra.mxu1 %v119_v26 }
  0x29   :  { %193 = vmatpush.msra.mxu2 %v72_v23  ;;  %103 = vmatpush.msra.mxu0 %v72_v23 }
  0x2a   :  { %208 = vmatpush.msra.mxu3 %v118_v30  ;;  %147 = vmatpush.msra.mxu1 %v118_v30 }
  0x2b   :  { %194 = vmatpush.msra.mxu2 %v71_v25  ;;  %104 = vmatpush.msra.mxu0 %v71_v25 }
  0x2c   :  { %209 = vmatpush.msra.mxu3 %v117_v31  ;;  %148 = vmatpush.msra.mxu1 %v117_v31 }
  0x2d   :  { %195 = vmatpush.msra.mxu2 %v70_v27  ;;  %105 = vmatpush.msra.mxu0 %v70_v27 }
  0x2e   :  { %109 = vmatmul.f32.vlgmr.msra.gmra.mxu2 %v69_v28  ;;  %106 = vmatmul.f32.vlgmr.msra.gmra.mxu0 %v68_v29 }
  0x2f   :  { %210 = vmatpush.msra.mxu3 %v116_v32  ;;  %149 = vmatpush.msra.mxu1 %v116_v32 }
  0x31   :  { %211 = vmatpush.msra.mxu3 %v115_v33  ;;  %150 = vmatpush.msra.mxu1 %v115_v33 }
  0xab   :  { %v107_v35 = vpop.f32.mrf.mxu0 }
  0xac   :  { %v108_v36 = vadd.f32 %v218_v34, %v107_v35 }
  0xae   :  { %v113_v37 = vmax.f32 %v108_v36, 0.0 }
  0xb0   :  { %151 = vmatmul.f32.vlgmr.msra.gmra.mxu1 %v113_v37 }
  0xb1   :  { %v110_v38 = vpop.f32.mrf.mxu2 }
  0xb2   :  { %v111_v39 = vadd.f32 %v218_v34, %v110_v38 }
  0xb4   :  { %v114_v40 = vmax.f32 %v111_v39, 0.0 }
  0xb6   :  { %154 = vmatmul.f32.vlgmr.msra.gmra.mxu3 %v114_v40 }
 0x12d   :  { %v152_v42 = vpop.f32.mrf.mxu1 }
 0x12e   :  { %v153_v43 = vadd.f32 %v219_v41, %v152_v42 }
 0x130   :  { %158 = vst [vmem:[#allocation8] sm:$0xff] %v153_v43 }
 0x139   :  { %v155_v44 = vpop.f32.mrf.mxu3 }
 0x13a   :  { %v156_v45 = vadd.f32 %v219_v41, %v155_v44 }
 0x13c   :  { %159 = vst [vmem:[#allocation8 + $0x8] sm:$0xff] %v156_v45 }
 0x13d   :  { %172 = dma.vmem_to_hbm [thread:$0]  %s165_s12, 256, %s167_s2, [#allocation4], %s323_s26, %s323_s26, %s324_s27  }
 0x13e   :  { %320 = dma.done.wait [#allocation4], 256  }
 0x13f   :  { %321 = vsyncadd [#allocation4], 4294967040 }
 0x140   :  { %177 = vsyncpa [#allocation3], 1 }
 0x141   :  { %178 = vsyncpa [#allocation6], 1 }
 0x142   :  { %179 = vsyncpa [#allocation4], 1 }

</bundles_post_ra>
